<compile_context>
chip_gen: v7x
topology: tpu7x:2x2x1
jax: 0.10.0
libtpu: 0.0.40
codegen_flags: <defaults>
</compile_context>

<pallas_src>
import jax
import jax.numpy as jnp
from jax.experimental import pallas as pl
from jax.experimental.pallas import tpu as pltpu

_F = 128    # fused / lane-padded feature width (2*hidden + 2 constant lanes <= 128)
_OUT = 8    # lane width of the kernel output (q1 = lane 0, q2 = lane 1)


def _critic_kernel(xa_ref, small_ref, big_ref, out_ref):
    """Twin-Q MLP as 3 MXU dots + 2 relus.  All biases are folded into the
    matmuls via a constant-1 input column / constant-1 lanes (see packing)."""
    # Layer 1 (both Q heads + bias) in a single K=8 pass: xa = [x | a | 1 | 0...].
    h = jnp.dot(xa_ref[...], small_ref[...], preferred_element_type=jnp.float32)
    h = jnp.maximum(h, 0.0).astype(big_ref.dtype)
    # Layer 2: block-diag(w2, w5); row 2H carries [b2|b5] and feeds lane 2H+1 = 1.
    h = jnp.dot(h, big_ref[0], preferred_element_type=jnp.float32)
    h = jnp.maximum(h, 0.0).astype(big_ref.dtype)
    # Layer 3: lanes 0/1 of the result are q1/q2 (b3/b6 come from the const-1 lane).
    out = jnp.dot(h, big_ref[1], preferred_element_type=jnp.float32)
    out_ref[...] = out[:, :_OUT].astype(out_ref.dtype)


def pack_critic_params(params, n_states, n_actions, hidden,
                       weights_dtype=jnp.bfloat16):
    """Pack the 12 torch-style (pre-transposed) params into two fused buffers.

    Done once on the host, outside the hot loop.  Weights in `params` are
    stored as (in_features, out_features); biases as (1, out_features).
    """
    D = n_states + n_actions
    H = hidden
    assert 2 * H + 2 <= _F, "need 2*hidden + 2 constant lanes <= 128"
    kin = max(8, ((D + 1 + 7) // 8) * 8)   # padded K of the layer-1 matmul
    c1 = 2 * H        # lane that equals 1 after layer 1 (carries b2|b5 forward)
    c2 = 2 * H + 1    # lane that equals 1 after layer 2 (carries b3|b6 forward)

    # --- small (kin, 128) f32 tile: rows 0..D-1 = layer-1 weights for [x|a],
    #     row D = fused layer-1 bias + a 1.0 at lane c1 (constant carrier). ---
    small = jnp.zeros((kin, _F), jnp.float32)
    small = small.at[0:D, 0:H].set(params["w1"]).at[0:D, H:2 * H].set(params["w4"])
    small = small.at[D, 0:H].set(params["b1"].reshape(-1))
    small = small.at[D, H:2 * H].set(params["b4"].reshape(-1))
    small = small.at[D, c1].set(1.0)

    # --- w_mid: block-diag(w2, w5); row c1 = [b2|b5] plus 1.0 -> lane c2. ---
    w_mid = jnp.zeros((_F, _F), jnp.float32)
    w_mid = w_mid.at[0:H, 0:H].set(params["w2"]).at[H:2 * H, H:2 * H].set(params["w5"])
    w_mid = w_mid.at[c1, 0:H].set(params["b2"].reshape(-1))
    w_mid = w_mid.at[c1, H:2 * H].set(params["b5"].reshape(-1))
    w_mid = w_mid.at[c1, c2].set(1.0)

    # --- w_out: lanes 0/1 hold w3/w6; row c2 holds (b3, b6). ---
    w_out = jnp.zeros((_F, _F), jnp.float32)
    w_out = w_out.at[0:H, 0].set(params["w3"].reshape(-1))
    w_out = w_out.at[H:2 * H, 1].set(params["w6"].reshape(-1))
    w_out = w_out.at[c2, 0].set(params["b3"].reshape(-1)[0])
    w_out = w_out.at[c2, 1].set(params["b6"].reshape(-1)[0])

    # bf16 MXU weights (f32 accumulation in the kernel).
    big = jnp.stack([w_mid, w_out], axis=0).astype(weights_dtype)
    return {"small": small, "big": big}


def critic_forward(x, a, packed, batch_tile=None, core_parallel=False):
    """Pallas implementation of Critic.forward: returns (q1, q2).

    batch_tile:
      * None (default): grid-less monolithic kernel.  Correct choice on
        single-TensorCore v5e/v6e (a grid is a serial loop there, ~0.35 us per
        step of pure overhead) as long as the B*(kin+_OUT)*4-byte activations
        fit the scoped VMEM limit.
      * On v7x (2 TCs/chip): batch_tile = ceil(B/2) rounded up to 8 so each
        core runs exactly one grid step; set core_parallel=True to request
        pltpu.CORE_PARALLEL semantics if plain "parallel" does not split.
    """
    B, n_states = x.shape
    n_actions = a.shape[1]
    D = n_states + n_actions
    kin = packed["small"].shape[0]

    # Pre-padded (B, kin) input: [x | a | 1 | 0...].  The constant-1 column
    # folds the layer-1 bias into the single K=kin MXU pass inside the kernel.
    ones = jnp.ones((B, 1), x.dtype)
    pad = jnp.zeros((B, kin - D - 1), x.dtype)
    xa = jnp.concatenate([x, a, ones, pad], axis=1)

    vmem = pl.BlockSpec(memory_space=pltpu.MemorySpace.VMEM)

    if batch_tile is None or B <= batch_tile:
        # Latency-bound / single-TC path: everything in VMEM at once, no grid.
        out = pl.pallas_call(
            _critic_kernel,
            out_shape=jax.ShapeDtypeStruct((B, _OUT), jnp.float32),
            in_specs=[vmem, vmem, vmem],
            out_specs=vmem,
        )(xa, packed["small"], packed["big"])
    else:
        TB = int(batch_tile)
        assert TB % 8 == 0, "batch_tile must be a multiple of 8"
        n_blocks = pl.cdiv(B, TB)
        Bp = n_blocks * TB
        if Bp != B:  # ragged batch: pad + slice instead of a silent fallback
            xa = jnp.pad(xa, ((0, Bp - B), (0, 0)))
        dim_sem = (pltpu.CORE_PARALLEL,) if core_parallel else ("parallel",)
        out = pl.pallas_call(
            _critic_kernel,
            out_shape=jax.ShapeDtypeStruct((Bp, _OUT), jnp.float32),
            grid=(n_blocks,),
            in_specs=[
                pl.BlockSpec((TB, kin), lambda i: (i, 0)),
                # Weights use constant index maps and stay resident across steps.
                pl.BlockSpec(packed["small"].shape, lambda i: (0, 0)),
                pl.BlockSpec(packed["big"].shape, lambda i: (0, 0, 0)),
            ],
            out_specs=pl.BlockSpec((TB, _OUT), lambda i: (i, 0)),
            compiler_params=pltpu.CompilerParams(dimension_semantics=dim_sem),
        )(xa, packed["small"], packed["big"])
        out = out[:B]

    # Narrow lane-packed output: q1 = lane 0, q2 = lane 1.
    return out[:, 0:1], out[:, 1:2]


def init_critic_params(key, n_states, n_actions, hidden):
    """torch.nn.Linear-style U(-1/sqrt(fan_in), 1/sqrt(fan_in)) init.
    Weights stored pre-transposed as (in_features, out_features)."""
    d_in = n_states + n_actions
    layers = [("1", d_in, hidden), ("2", hidden, hidden), ("3", hidden, 1),
              ("4", d_in, hidden), ("5", hidden, hidden), ("6", hidden, 1)]
    params = {}
    keys = jax.random.split(key, 2 * len(layers))
    for idx, (name, fan_in, fan_out) in enumerate(layers):
        bound = 1.0 / (fan_in ** 0.5)
        params[f"w{name}"] = jax.random.uniform(keys[2 * idx], (fan_in, fan_out),
                                                jnp.float32, -bound, bound)
        params[f"b{name}"] = jax.random.uniform(keys[2 * idx + 1], (1, fan_out),
                                                jnp.float32, -bound, bound)
    return params


if __name__ == "__main__":
    # Pendulum-like config: n_states=3, n_actions=1, hidden=32, batch=2
    n_states, n_actions, hidden, batch = 3, 1, 32, 2

    key = jax.random.PRNGKey(0)
    k_params, k_x, k_a, k_x2, k_a2 = jax.random.split(key, 5)

    params = init_critic_params(k_params, n_states, n_actions, hidden)
    packed = pack_critic_params(params, n_states, n_actions, hidden)  # host-side, once

    def reference(x, a):
        cat = jnp.concatenate([x, a], axis=1)
        r1 = jnp.maximum(cat @ params["w1"] + params["b1"], 0.0)
        r1 = jnp.maximum(r1 @ params["w2"] + params["b2"], 0.0)
        r1 = r1 @ params["w3"] + params["b3"]
        r2 = jnp.maximum(cat @ params["w4"] + params["b4"], 0.0)
        r2 = jnp.maximum(r2 @ params["w5"] + params["b5"], 0.0)
        r2 = r2 @ params["w6"] + params["b6"]
        return r1, r2

    fwd = jax.jit(critic_forward, static_argnames=("batch_tile", "core_parallel"))

    # --- small batch (B=2): grid-less fused kernel (v5e/v6e default path) ---
    x = jax.random.normal(k_x, (batch, n_states), jnp.float32)
    a = jax.random.normal(k_a, (batch, n_actions), jnp.float32)
    q1, q2 = fwd(x, a, packed)
    jax.block_until_ready((q1, q2))
    r1, r2 = reference(x, a)
    assert q1.shape == (batch, 1) and q2.shape == (batch, 1)
    # bf16 MXU weights with f32 accumulation -> loosened tolerance (RL critic).
    assert jnp.allclose(q1, r1, atol=5e-2, rtol=5e-2)
    assert jnp.allclose(q2, r2, atol=5e-2, rtol=5e-2)

    # --- larger ragged batch: cdiv/padded batch grid (v7x-style 2-TC split) ---
    B2, TB = 300, 128          # 300 % 128 != 0 -> exercises the padded last block
    x2 = jax.random.normal(k_x2, (B2, n_states), jnp.float32)
    a2 = jax.random.normal(k_a2, (B2, n_actions), jnp.float32)
    q1b, q2b = fwd(x2, a2, packed, batch_tile=TB)
    jax.block_until_ready((q1b, q2b))
    r1b, r2b = reference(x2, a2)
    assert q1b.shape == (B2, 1) and q2b.shape == (B2, 1)
    assert jnp.allclose(q1b, r1b, atol=5e-2, rtol=5e-2)
    assert jnp.allclose(q2b, r2b, atol=5e-2, rtol=5e-2)

    print("KERNEL_OK")
</pallas_src>

<mosaic_0001>
module attributes {stable_mosaic.version = 11 : i64} {
  func.func @_critic_kernel(%arg0: memref<2x8xf32, #tpu.memory_space<vmem>>, %arg1: memref<8x128xf32, #tpu.memory_space<vmem>>, %arg2: memref<2x128x128xbf16, #tpu.memory_space<vmem>>, %arg3: memref<2x8xf32, #tpu.memory_space<vmem>>) attributes {dimension_semantics = [], scalar_prefetch = 0 : i64, scratch_operands = 0 : i64, tpu.core_type = #tpu.core_type<tc>} {
    %c0 = arith.constant 0 : index
    %c0_0 = arith.constant 0 : index
    %0 = vector.load %arg0[%c0, %c0_0] : memref<2x8xf32, #tpu.memory_space<vmem>>, vector<2x8xf32>
    %c0_1 = arith.constant 0 : index
    %c0_2 = arith.constant 0 : index
    %1 = vector.load %arg1[%c0_1, %c0_2] : memref<8x128xf32, #tpu.memory_space<vmem>>, vector<8x128xf32>
    %cst = arith.constant dense<0.000000e+00> : vector<2x128xf32>
    %2 = tpu.matmul %0, %1, %cst {dimension_numbers = #tpu.dot_dimension_numbers<[1], [0], [0], [1], [0, 0, 1, 1], [], []>} : vector<2x8xf32>, vector<8x128xf32>, vector<2x128xf32> -> vector<2x128xf32>
    %cst_3 = arith.constant 0.000000e+00 : f32
    %3 = vector.broadcast %cst_3 : f32 to vector<2x128xf32>
    %4 = arith.maximumf %2, %3 : vector<2x128xf32>
    %5 = arith.truncf %4 : vector<2x128xf32> to vector<2x128xbf16>
    %c0_4 = arith.constant 0 : index
    %c0_5 = arith.constant 0 : index
    %c0_6 = arith.constant 0 : index
    %6 = vector.load %arg2[%c0_4, %c0_5, %c0_6] : memref<2x128x128xbf16, #tpu.memory_space<vmem>>, vector<1x128x128xbf16>
    %7 = vector.shape_cast %6 : vector<1x128x128xbf16> to vector<128x128xbf16>
    %cst_7 = arith.constant dense<0.000000e+00> : vector<2x128xf32>
    %8 = tpu.matmul %5, %7, %cst_7 {dimension_numbers = #tpu.dot_dimension_numbers<[1], [0], [0], [1], [0, 0, 1, 1], [], []>} : vector<2x128xbf16>, vector<128x128xbf16>, vector<2x128xf32> -> vector<2x128xf32>
    %cst_8 = arith.constant 0.000000e+00 : f32
    %9 = vector.broadcast %cst_8 : f32 to vector<2x128xf32>
    %10 = arith.maximumf %8, %9 : vector<2x128xf32>
    %11 = arith.truncf %10 : vector<2x128xf32> to vector<2x128xbf16>
    %c1 = arith.constant 1 : index
    %c0_9 = arith.constant 0 : index
    %c0_10 = arith.constant 0 : index
    %12 = vector.load %arg2[%c1, %c0_9, %c0_10] : memref<2x128x128xbf16, #tpu.memory_space<vmem>>, vector<1x128x128xbf16>
    %13 = vector.shape_cast %12 : vector<1x128x128xbf16> to vector<128x128xbf16>
    %cst_11 = arith.constant dense<0.000000e+00> : vector<2x128xf32>
    %14 = tpu.matmul %11, %13, %cst_11 {dimension_numbers = #tpu.dot_dimension_numbers<[1], [0], [0], [1], [0, 0, 1, 1], [], []>} : vector<2x128xbf16>, vector<128x128xbf16>, vector<2x128xf32> -> vector<2x128xf32>
    %15 = vector.extract_strided_slice %14 {offsets = [0, 0], sizes = [2, 8], strides = [1, 1]} : vector<2x128xf32> to vector<2x8xf32>
    %c0_12 = arith.constant 0 : index
    %c0_13 = arith.constant 0 : index
    %16 = vector.load %arg3[%c0_12, %c0_13] : memref<2x8xf32, #tpu.memory_space<vmem>>, vector<2x8xf32>
    tpu.vector_store %arg3[%c0_12, %c0_13], %15 {strides = array<i32>} : memref<2x8xf32, #tpu.memory_space<vmem>>, vector<2x8xf32>,
    return
  }
}

</mosaic_0001>

<bundles_post_ra>
// kernel: critic_forward.1
= control target key start
LH: loop header
LB: loop body
LE: loop exit
PB: predicated region body
PF: predicated region fallthrough
CT: control target
= control target key end

     0   :  { %8 = vsyncpa [#allocation3], 0  ;;  %s452_s12 = smov [#allocation2]   ;;  %s498_s0 = inlined_call_operand.vmem [shape: f32[2,8], index: 0, kind: input, shape index: {}]   ;;  %s499_s1 = inlined_call_operand.vmem [shape: f32[8,128], index: 1, kind: input, shape index: {}]   ;;  %s500_s2 = inlined_call_operand.hbm [shape: bf16[2,128,128], index: 2, kind: input, shape index: {}]   ;;  %s501_s3 = inlined_call_operand.vmem [shape: f32[2,8], index: 3, kind: output, shape index: {}]  }
   0x1   :  { %s18_s13 = sshll.u32 %s452_s12, 4  ;;  %s428_s16 = scalar_lea.hbm %s500_s2, 2048  ;;  %s19_s13 = int_to_ptr.vmem [resolvable:$true] %s18_s13 }
   0x2   :  { %p429_p0 = scmp.ne.s32.totalorder %s500_s2, %s428_s16  ;;  %p432_p1 = scmp.lt.u32.totalorder %s428_s16, %s500_s2 }
   0x4   :  { %p434_p2 = pnand %p432_p1, %p429_p0 }
   0x6   :  { %437 = shalt.err (!%p434_p2)
}
   0x7   :  { %s438_s21 = scalar_lea.vmem %s19_s13, 2048  ;;  %p443_p4 = scmp.lt.s32.totalorder %s19_s13, %s19_s13 }
   0x8   :  { %p439_p3 = scmp.ne.s32.totalorder %s19_s13, %s438_s21  ;;  %p444_p5 = scmp.lt.s32.totalorder %s438_s21, %s438_s21 }
   0xa   :  { %p445_p6 = por %p444_p5, %p443_p4 }
   0xc   :  { %p446_p7 = pnand %p445_p6, %p439_p3 }
   0xe   :  { %449 = shalt.err (!%p446_p7)
}
   0xf   :  { %s453_s22 = smov 64   ;;  %s454_s23 = smov 4  }
  0x10   :  { %24 = dma.hbm_to_vmem [thread:$0]  %s500_s2, 2048, %s19_s13, [#allocation3], %s453_s22, %s453_s22, %s454_s23  }
  0x11   :  { %450 = dma.done.wait [#allocation3], 2048  }
  0x12   :  { %451 = vsyncadd [#allocation3], 4294965248  ;;  %v455_v0 = vmov 0.0   ;;  %vm456_vm0 = vmmov 0   ;;  %vm31_vm1 = vcmask 64512   ;;  %v30_v1 = vld [vmem:[%s499_s1] sm:$0xff] }
  0x13   :  { %362 = vmatprep.subr.mxu0 %v455_v0  ;;  %364 = vmatprep.mubr.msk.f32.mxu0 %vm456_vm0, %v455_v0  ;;  %v29_v2 = vld [vmem:[%s498_s0] sm:$0x3]  ;;  %v413_v4 = vld [vmem:[#allocation2 + $0x8] sm:$0xff]   ;;  %v414_v5 = vld [vmem:[#allocation2 + $0x10] sm:$0xff]   ;;  %vm318_vm2 = vcmask 58368  }
  0x14   :  { %367 = vmatprep.subr.bf16.mxu1 %v455_v0  ;;  %383 = vmatprep.mubr.msk.bf16.mxu1 %vm456_vm0, %v455_v0  ;;  %v412_v3 = vld [vmem:[#allocation2] sm:$0xff]   ;;  %v415_v6 = vld [vmem:[#allocation2 + $0x18] sm:$0xff]   ;;  %v417_v8 = vld [vmem:[#allocation2 + $0x28] sm:$0xff]  }
  0x15   :  { %363 = vmatpush3.msra.mxu0 %v30_v1  ;;  %368 = vmatpush3.bf16.msra.mxu1 %v412_v3  ;;  %v416_v7 = vld [vmem:[#allocation2 + $0x20] sm:$0xff]   ;;  %v418_v9 = vld [vmem:[#allocation2 + $0x30] sm:$0xff]   ;;  %v419_v10 = vld [vmem:[#allocation2 + $0x38] sm:$0xff]  }
  0x16   :  { %365 = vmatmul.mubr.msk.f32.vlgmr.msra.gmra.mrb[0].mxu0 %vm31_vm1, %v29_v2  ;;  %387 = vmatprep.subr.bf16.mxu0 %v455_v0  ;;  %v420_v11 = vld [vmem:[#allocation2 + $0x40] sm:$0xff]   ;;  %v421_v12 = vld [vmem:[#allocation2 + $0x48] sm:$0xff]   ;;  %v422_v13 = vld [vmem:[#allocation2 + $0x50] sm:$0xff]  }
  0x17   :  { %403 = vmatprep.mubr.msk.bf16.mxu0 %vm456_vm0, %v455_v0  ;;  %369 = vmatprep.subr.bf16.mxu1 %v455_v0  ;;  %v423_v14 = vld [vmem:[#allocation2 + $0x58] sm:$0xff]   ;;  %v424_v15 = vld [vmem:[#allocation2 + $0x60] sm:$0xff]   ;;  %v425_v16 = vld [vmem:[#allocation2 + $0x68] sm:$0xff]  }
  0x18   :  { %388 = vmatpush3.bf16.msra.mxu0 %v420_v11  ;;  %v426_v17 = vld [vmem:[#allocation2 + $0x70] sm:$0xff]   ;;  %v427_v22 = vld [vmem:[#allocation2 + $0x78] sm:$0xff]  }
  0x19   :  { %370 = vmatpush3.bf16.msra.mxu1 %v413_v4  ;;  %389 = vmatprep.subr.bf16.mxu0 %v455_v0 }
  0x1a   :  { %371 = vmatprep.subr.bf16.mxu1 %v455_v0 }
  0x1c   :  { %390 = vmatpush3.bf16.msra.mxu0 %v421_v12 }
  0x1d   :  { %372 = vmatpush3.bf16.msra.mxu1 %v414_v5  ;;  %391 = vmatprep.subr.bf16.mxu0 %v455_v0 }
  0x1e   :  { %373 = vmatprep.subr.bf16.mxu1 %v455_v0 }
  0x20   :  { %392 = vmatpush3.bf16.msra.mxu0 %v422_v13 }
  0x21   :  { %374 = vmatpush3.bf16.msra.mxu1 %v415_v6  ;;  %393 = vmatprep.subr.bf16.mxu0 %v455_v0 }
  0x22   :  { %375 = vmatprep.subr.bf16.mxu1 %v455_v0 }
  0x24   :  { %394 = vmatpush3.bf16.msra.mxu0 %v423_v14 }
  0x25   :  { %376 = vmatpush3.bf16.msra.mxu1 %v416_v7  ;;  %395 = vmatprep.subr.bf16.mxu0 %v455_v0 }
  0x26   :  { %377 = vmatprep.subr.bf16.mxu1 %v455_v0 }
  0x28   :  { %396 = vmatpush3.bf16.msra.mxu0 %v424_v15 }
  0x29   :  { %378 = vmatpush3.bf16.msra.mxu1 %v417_v8  ;;  %397 = vmatprep.subr.bf16.mxu0 %v455_v0 }
  0x2a   :  { %379 = vmatprep.subr.bf16.mxu1 %v455_v0 }
  0x2c   :  { %398 = vmatpush3.bf16.msra.mxu0 %v425_v16 }
  0x2d   :  { %380 = vmatpush3.bf16.msra.mxu1 %v418_v9  ;;  %399 = vmatprep.subr.bf16.mxu0 %v455_v0 }
  0x2e   :  { %381 = vmatprep.subr.bf16.mxu1 %v455_v0 }
  0x30   :  { %400 = vmatpush3.bf16.msra.mxu0 %v426_v17 }
  0x31   :  { %382 = vmatpush3.bf16.msra.mxu1 %v419_v10  ;;  %401 = vmatprep.subr.bf16.mxu0 %v455_v0 }
  0x34   :  { %402 = vmatpush3.bf16.msra.mxu0 %v427_v22 }
  0xe9   :  { %v101_v18 = vpop.f32.mrb[0].mxu0 }
  0xea   :  { %v105_v19 = vmax.f32 %v101_v18, 0.0  ;;  %v366_v20 = vpop.f32.mrb[1].mxu0 }
  0xec   :  { %v106_v21 = vpack.c.bf16 %v105_v19, %v105_v19 }
  0xee   :  { %384 = vmatmul.mubr.bf16.vlgmr.msra.gmra.mrb[0].mxu1 %v106_v21 }
 0x1c1   :  { %v205_v23 = vpop.f32.mrb[0].mxu1 }
 0x1c2   :  { %v211_v24 = vmax.f32 %v205_v23, 0.0  ;;  %v385_v25 = vpop.f32.mrb[1].mxu1 }
 0x1c3   :  { %v208_v26 = vpop.f32.mrb[2].mxu1 }
 0x1c4   :  { %v212_v27 = vpack.c.bf16 %v211_v24, %v211_v24  ;;  %v386_v28 = vpop.f32.mrb[3].mxu1 }
 0x1c6   :  { %404 = vmatmul.mubr.bf16.vlgmr.msra.gmra.mrb[4].mxu0 %v212_v27 }
 0x299   :  { %v312_v29 = vpop.f32.mrb[4].mxu0 }
 0x29a   :  { %319 = vst.msk [vmem:[%s501_s3] sm:$0x3] %vm318_vm2, %v312_v29  ;;  %v405_v30 = vpop.f32.mrb[5].mxu0 }
 0x29b   :  { %v315_v31 = vpop.f32.mrb[6].mxu0 }
 0x29c   :  { %v406_v32 = vpop.f32.mrb[7].mxu0 }
 0x29d   :  { %324 = vsyncpa [#allocation3], 1 }

</bundles_post_ra>
